<compile_context>
chip_gen: v7x
topology: tpu7x:2x2x1
jax: 0.10.0
libtpu: 0.0.40
codegen_flags: <defaults>
</compile_context>

<pallas_src>
import functools

import jax
import jax.numpy as jnp
import numpy as np
from jax.experimental import pallas as pl
from jax.experimental.pallas import tpu as pltpu


def ggnn_kernel(x_ref, adjt_ref, w_ref, wih_ref, whh_ref, bih_ref, bhh_ref, o_ref,
                *, num_layers, G, N, H, mm_dtype):
    # Recurrent state stays f32; matmul operands are cast to mm_dtype (f32 or bf16)
    # with f32 accumulation forced via preferred_element_type.
    h = x_ref[...].astype(jnp.float32)                 # (G*N, H)
    adj_t = adjt_ref[...].astype(mm_dtype)             # (G, N, N), values are exactly 0/1
    wih = wih_ref[...]                                 # (H, 3H), gate order [r, z, n]
    whh = whh_ref[...]                                 # (H, 3H)
    # Hoist bias loads out of the (statically unrolled) layer loop.
    bih = bih_ref[...].astype(jnp.float32)             # (1, 3H)
    bhh = bhh_ref[...].astype(jnp.float32)             # (1, 3H)

    for l in range(num_layers):                        # static unroll, num_layers small
        hc = h.astype(mm_dtype)
        # message transform on the whole (G*N, H) slab
        m = jnp.dot(hc, w_ref[l], preferred_element_type=jnp.float32)      # (G*N, H) f32

        # per-graph sum aggregation: agg[g] = A[g]^T @ m[g]
        # (adjacency already transposed + binarized in the wrapper)
        if G == 1:
            agg = jnp.dot(adj_t[0], m.astype(mm_dtype),
                          preferred_element_type=jnp.float32)               # (N, H)
        else:
            agg = jnp.einsum('gij,gjd->gid',
                             adj_t, m.reshape(G, N, H).astype(mm_dtype),
                             preferred_element_type=jnp.float32).reshape(G * N, H)

        # Fused GRU gates: gi/gh are (G*N, 3H) with columns [r | z | n].
        gi = jnp.dot(agg.astype(mm_dtype), wih, preferred_element_type=jnp.float32) + bih
        gh = jnp.dot(hc, whh, preferred_element_type=jnp.float32) + bhh

        r = jax.nn.sigmoid(gi[:, :H] + gh[:, :H])
        z = jax.nn.sigmoid(gi[:, H:2 * H] + gh[:, H:2 * H])
        n = jnp.tanh(gi[:, 2 * H:] + r * gh[:, 2 * H:])
        h = (1.0 - z) * n + z * h

    o_ref[...] = h.astype(o_ref.dtype)


def _pick_graph_block(B, N, target_rows=256):
    """Pack G graphs per grid step: aim for ~target_rows matmul rows per step, but keep
    at least 2 grid steps when B allows (so v7x's two TensorCores both get work)."""
    G = max(1, min(B, target_rows // max(N, 1)))
    if B >= 2:
        G = max(1, min(G, B // 2))
    while B % G != 0:       # require an even blocking of the batch
        G -= 1
    return G


def dense_ggnn_forward(x, adj, weight, w_ih, w_hh, b_ih, b_hh, *,
                       use_bf16=False, target_rows=256):
    """x: (B, N, D) float32, adj: (B, N, N); returns (B, N, H)."""
    B, N, D = x.shape
    L, H, _ = weight.shape
    assert D <= H, "GatedGraphConv requires input dim <= out_channels"
    if D < H:  # zero-pad features up to out_channels (matches GatedGraphConv)
        x = jnp.concatenate([x, jnp.zeros((B, N, H - D), x.dtype)], axis=-1)

    mm_dtype = jnp.bfloat16 if use_bf16 else jnp.float32
    G = _pick_graph_block(B, N, target_rows)

    # Node features as one (B*N, H) slab; each grid step sees a (G*N, H) block.
    x2d = x.reshape(B * N, H).astype(jnp.float32)

    # Adjacency: binarize (dense_to_sparse drops edge values), pre-transpose so the
    # in-kernel aggregation is a canonical (dst x src) @ (src x feat) matmul, store as
    # bf16 (0/1 exact) to halve its HBM traffic.
    adj_t = jnp.transpose(adj != 0, (0, 2, 1)).astype(jnp.bfloat16)          # (B, N, N)

    # Fused GRU gate weights: gi = agg @ Wih_cat, gh = h @ Whh_cat, with PyTorch's
    # [r, z, n] gate order along the 3H output axis.
    wih_cat = jnp.transpose(w_ih).astype(mm_dtype)                           # (H, 3H)
    whh_cat = jnp.transpose(w_hh).astype(mm_dtype)                           # (H, 3H)
    w_layers = weight.astype(mm_dtype)                                       # (L, H, H)
    bih_r = b_ih.reshape(1, 3 * H).astype(jnp.float32)
    bhh_r = b_hh.reshape(1, 3 * H).astype(jnp.float32)

    kernel = functools.partial(ggnn_kernel, num_layers=L, G=G, N=N, H=H,
                               mm_dtype=mm_dtype)
    out2d = pl.pallas_call(
        kernel,
        out_shape=jax.ShapeDtypeStruct((B * N, H), jnp.float32),
        grid=(B // G,),
        in_specs=[
            pl.BlockSpec((G * N, H), lambda b: (b, 0)),      # h0 slab (G graphs)
            pl.BlockSpec((G, N, N), lambda b: (b, 0, 0)),    # A^T, binarized bf16
            # Constant-index weight blocks (resident across the grid).  At production
            # sizes (H>=512, L>=8) single-buffer these (pipeline_mode=pl.Buffered(1))
            # to save VMEM, which matters most on v7x's 64 MiB VMEM.
            pl.BlockSpec((L, H, H), lambda b: (0, 0, 0)),    # layer weights
            pl.BlockSpec((H, 3 * H), lambda b: (0, 0)),      # fused W_ih^T
            pl.BlockSpec((H, 3 * H), lambda b: (0, 0)),      # fused W_hh^T
            pl.BlockSpec((1, 3 * H), lambda b: (0, 0)),      # b_ih
            pl.BlockSpec((1, 3 * H), lambda b: (0, 0)),      # b_hh
        ],
        out_specs=pl.BlockSpec((G * N, H), lambda b: (b, 0)),
        compiler_params=pltpu.CompilerParams(dimension_semantics=("parallel",)),
    )(x2d, adj_t, w_layers, wih_cat, whh_cat, bih_r, bhh_r)
    return out2d.reshape(B, N, H)


def dense_ggnn_reference(x, adj, weight, w_ih, w_hh, b_ih, b_hh):
    """Pure-JAX reference mirroring torch_geometric GatedGraphConv + nn.GRUCell."""
    B, N, D = x.shape
    L, H, _ = weight.shape
    if D < H:
        x = jnp.concatenate([x, jnp.zeros((B, N, H - D), x.dtype)], axis=-1)
    h = x
    A = (adj != 0).astype(jnp.float32)
    for l in range(L):
        m = jnp.einsum('bnd,de->bne', h, weight[l])
        agg = jnp.einsum('bji,bjd->bid', A, m)
        gi = agg @ w_ih.T + b_ih
        gh = h @ w_hh.T + b_hh
        i_r, i_z, i_n = jnp.split(gi, 3, axis=-1)
        h_r, h_z, h_n = jnp.split(gh, 3, axis=-1)
        r = jax.nn.sigmoid(i_r + h_r)
        z = jax.nn.sigmoid(i_z + h_z)
        n = jnp.tanh(i_n + r * h_n)
        h = (1.0 - z) * n + z * h
    return h


if __name__ == "__main__":
    B, N, D = 2, 16, 16
    out_channels, num_layers = 32, 2
    H = out_channels

    key = jax.random.PRNGKey(0)
    kx, kadj, kw, kwih, kwhh, kbih, kbhh = jax.random.split(key, 7)

    x = jax.random.normal(kx, (B, N, D), dtype=jnp.float32)
    adj = (jax.random.uniform(kadj, (B, N, N)) < 0.3).astype(jnp.float32)

    # Deterministic synthetic parameters (shapes match GatedGraphConv + GRUCell).
    s = 1.0 / np.sqrt(H)
    weight = jax.random.uniform(kw, (num_layers, H, H), minval=-s, maxval=s, dtype=jnp.float32)
    w_ih = jax.random.uniform(kwih, (3 * H, H), minval=-s, maxval=s, dtype=jnp.float32)
    w_hh = jax.random.uniform(kwhh, (3 * H, H), minval=-s, maxval=s, dtype=jnp.float32)
    b_ih = jax.random.uniform(kbih, (3 * H,), minval=-s, maxval=s, dtype=jnp.float32)
    b_hh = jax.random.uniform(kbhh, (3 * H,), minval=-s, maxval=s, dtype=jnp.float32)

    ref = dense_ggnn_reference(x, adj, weight, w_ih, w_hh, b_ih, b_hh)

    # Exact-semantics path (f32 MXU operands): tight check.
    out = dense_ggnn_forward(x, adj, weight, w_ih, w_hh, b_ih, b_hh, use_bf16=False)
    out = jax.block_until_ready(out)
    np.testing.assert_allclose(np.asarray(out), np.asarray(ref), rtol=1e-5, atol=1e-5)

    # bf16 MXU-operand path (f32 accumulation): looser check.
    out_bf16 = dense_ggnn_forward(x, adj, weight, w_ih, w_hh, b_ih, b_hh, use_bf16=True)
    out_bf16 = jax.block_until_ready(out_bf16)
    np.testing.assert_allclose(np.asarray(out_bf16), np.asarray(ref), rtol=5e-2, atol=1e-1)

    assert out.shape == (B, N, H)
    print("KERNEL_OK")
</pallas_src>

<mosaic_0001>
module attributes {stable_mosaic.version = 11 : i64} {
  func.func @ggnn_kernel(%arg0: i32, %arg1: memref<16x32xf32, #tpu.memory_space<vmem>>, %arg2: memref<1x16x16xbf16, #tpu.memory_space<vmem>>, %arg3: memref<2x32x32xf32, #tpu.memory_space<vmem>>, %arg4: memref<32x96xf32, #tpu.memory_space<vmem>>, %arg5: memref<32x96xf32, #tpu.memory_space<vmem>>, %arg6: memref<1x96xf32, #tpu.memory_space<vmem>>, %arg7: memref<1x96xf32, #tpu.memory_space<vmem>>, %arg8: memref<16x32xf32, #tpu.memory_space<vmem>>) attributes {dimension_semantics = [#tpu.dimension_semantics<parallel>], iteration_bounds = array<i64: 2>, scalar_prefetch = 0 : i64, scratch_operands = 0 : i64, tpu.core_type = #tpu.core_type<tc>, window_params = [{transform_indices = @transform_0, window_bounds = array<i64: 16, 32>}, {transform_indices = @transform_1, window_bounds = array<i64: 1, 16, 16>}, {pipeline_mode = #tpu.pipeline_mode<synchronous>, transform_indices = @transform_2, window_bounds = array<i64: 2, 32, 32>}, {pipeline_mode = #tpu.pipeline_mode<synchronous>, transform_indices = @transform_3, window_bounds = array<i64: 32, 96>}, {pipeline_mode = #tpu.pipeline_mode<synchronous>, transform_indices = @transform_4, window_bounds = array<i64: 32, 96>}, {pipeline_mode = #tpu.pipeline_mode<synchronous>, transform_indices = @transform_5, window_bounds = array<i64: 1, 96>}, {pipeline_mode = #tpu.pipeline_mode<synchronous>, transform_indices = @transform_6, window_bounds = array<i64: 1, 96>}, {transform_indices = @transform_7, window_bounds = array<i64: 16, 32>}]} {
    %c0 = arith.constant 0 : index
    %c0_0 = arith.constant 0 : index
    %0 = vector.load %arg1[%c0, %c0_0] : memref<16x32xf32, #tpu.memory_space<vmem>>, vector<16x32xf32>
    %c0_1 = arith.constant 0 : index
    %c0_2 = arith.constant 0 : index
    %c0_3 = arith.constant 0 : index
    %1 = vector.load %arg2[%c0_1, %c0_2, %c0_3] : memref<1x16x16xbf16, #tpu.memory_space<vmem>>, vector<1x16x16xbf16>
    %2 = arith.extf %1 : vector<1x16x16xbf16> to vector<1x16x16xf32>
    %c0_4 = arith.constant 0 : index
    %c0_5 = arith.constant 0 : index
    %3 = vector.load %arg4[%c0_4, %c0_5] : memref<32x96xf32, #tpu.memory_space<vmem>>, vector<32x96xf32>
    %c0_6 = arith.constant 0 : index
    %c0_7 = arith.constant 0 : index
    %4 = vector.load %arg5[%c0_6, %c0_7] : memref<32x96xf32, #tpu.memory_space<vmem>>, vector<32x96xf32>
    %c0_8 = arith.constant 0 : index
    %c0_9 = arith.constant 0 : index
    %5 = vector.load %arg6[%c0_8, %c0_9] : memref<1x96xf32, #tpu.memory_space<vmem>>, vector<1x96xf32>
    %c0_10 = arith.constant 0 : index
    %c0_11 = arith.constant 0 : index
    %6 = vector.load %arg7[%c0_10, %c0_11] : memref<1x96xf32, #tpu.memory_space<vmem>>, vector<1x96xf32>
    %c0_12 = arith.constant 0 : index
    %c0_13 = arith.constant 0 : index
    %c0_14 = arith.constant 0 : index
    %7 = vector.load %arg3[%c0_12, %c0_13, %c0_14] : memref<2x32x32xf32, #tpu.memory_space<vmem>>, vector<1x32x32xf32>
    %8 = vector.shape_cast %7 : vector<1x32x32xf32> to vector<32x32xf32>
    %cst = arith.constant dense<0.000000e+00> : vector<16x32xf32>
    %9 = tpu.matmul %0, %8, %cst {dimension_numbers = #tpu.dot_dimension_numbers<[1], [0], [0], [1], [0, 0, 1, 1], [], []>} : vector<16x32xf32>, vector<32x32xf32>, vector<16x32xf32> -> vector<16x32xf32>
    %10 = vector.shape_cast %2 : vector<1x16x16xf32> to vector<16x16xf32>
    %cst_15 = arith.constant dense<0.000000e+00> : vector<16x32xf32>
    %11 = tpu.matmul %10, %9, %cst_15 {dimension_numbers = #tpu.dot_dimension_numbers<[1], [0], [0], [1], [0, 0, 1, 1], [], []>} : vector<16x16xf32>, vector<16x32xf32>, vector<16x32xf32> -> vector<16x32xf32>
    %cst_16 = arith.constant dense<0.000000e+00> : vector<16x96xf32>
    %12 = tpu.matmul %11, %3, %cst_16 {dimension_numbers = #tpu.dot_dimension_numbers<[1], [0], [0], [1], [0, 0, 1, 1], [], []>} : vector<16x32xf32>, vector<32x96xf32>, vector<16x96xf32> -> vector<16x96xf32>
    %13 = vector.broadcast %5 : vector<1x96xf32> to vector<16x96xf32>
    %14 = arith.addf %12, %13 : vector<16x96xf32>
    %cst_17 = arith.constant dense<0.000000e+00> : vector<16x96xf32>
    %15 = tpu.matmul %0, %4, %cst_17 {dimension_numbers = #tpu.dot_dimension_numbers<[1], [0], [0], [1], [0, 0, 1, 1], [], []>} : vector<16x32xf32>, vector<32x96xf32>, vector<16x96xf32> -> vector<16x96xf32>
    %16 = vector.broadcast %6 : vector<1x96xf32> to vector<16x96xf32>
    %17 = arith.addf %15, %16 : vector<16x96xf32>
    %18 = vector.extract_strided_slice %14 {offsets = [0, 0], sizes = [16, 32], strides = [1, 1]} : vector<16x96xf32> to vector<16x32xf32>
    %19 = vector.extract_strided_slice %17 {offsets = [0, 0], sizes = [16, 32], strides = [1, 1]} : vector<16x96xf32> to vector<16x32xf32>
    %20 = arith.addf %18, %19 : vector<16x32xf32>
    %21 = arith.negf %20 : vector<16x32xf32>
    %22 = math.exp %21 : vector<16x32xf32>
    %cst_18 = arith.constant 1.000000e+00 : f32
    %23 = vector.broadcast %cst_18 : f32 to vector<16x32xf32>
    %24 = arith.addf %23, %22 : vector<16x32xf32>
    %25 = arith.divf %23, %24 : vector<16x32xf32>
    %26 = vector.extract_strided_slice %14 {offsets = [0, 32], sizes = [16, 32], strides = [1, 1]} : vector<16x96xf32> to vector<16x32xf32>
    %27 = vector.extract_strided_slice %17 {offsets = [0, 32], sizes = [16, 32], strides = [1, 1]} : vector<16x96xf32> to vector<16x32xf32>
    %28 = arith.addf %26, %27 : vector<16x32xf32>
    %29 = arith.negf %28 : vector<16x32xf32>
    %30 = math.exp %29 : vector<16x32xf32>
    %cst_19 = arith.constant 1.000000e+00 : f32
    %31 = vector.broadcast %cst_19 : f32 to vector<16x32xf32>
    %32 = arith.addf %31, %30 : vector<16x32xf32>
    %33 = arith.divf %31, %32 : vector<16x32xf32>
    %34 = vector.extract_strided_slice %14 {offsets = [0, 64], sizes = [16, 32], strides = [1, 1]} : vector<16x96xf32> to vector<16x32xf32>
    %35 = vector.extract_strided_slice %17 {offsets = [0, 64], sizes = [16, 32], strides = [1, 1]} : vector<16x96xf32> to vector<16x32xf32>
    %36 = arith.mulf %25, %35 : vector<16x32xf32>
    %37 = arith.addf %34, %36 : vector<16x32xf32>
    %38 = math.tanh %37 : vector<16x32xf32>
    %cst_20 = arith.constant 1.000000e+00 : f32
    %39 = vector.broadcast %cst_20 : f32 to vector<16x32xf32>
    %40 = arith.subf %39, %33 : vector<16x32xf32>
    %41 = arith.mulf %40, %38 : vector<16x32xf32>
    %42 = arith.mulf %33, %0 : vector<16x32xf32>
    %43 = arith.addf %41, %42 : vector<16x32xf32>
    %c1 = arith.constant 1 : index
    %c0_21 = arith.constant 0 : index
    %c0_22 = arith.constant 0 : index
    %44 = vector.load %arg3[%c1, %c0_21, %c0_22] : memref<2x32x32xf32, #tpu.memory_space<vmem>>, vector<1x32x32xf32>
    %45 = vector.shape_cast %44 : vector<1x32x32xf32> to vector<32x32xf32>
    %cst_23 = arith.constant dense<0.000000e+00> : vector<16x32xf32>
    %46 = tpu.matmul %43, %45, %cst_23 {dimension_numbers = #tpu.dot_dimension_numbers<[1], [0], [0], [1], [0, 0, 1, 1], [], []>} : vector<16x32xf32>, vector<32x32xf32>, vector<16x32xf32> -> vector<16x32xf32>
    %47 = vector.shape_cast %2 : vector<1x16x16xf32> to vector<16x16xf32>
    %cst_24 = arith.constant dense<0.000000e+00> : vector<16x32xf32>
    %48 = tpu.matmul %47, %46, %cst_24 {dimension_numbers = #tpu.dot_dimension_numbers<[1], [0], [0], [1], [0, 0, 1, 1], [], []>} : vector<16x16xf32>, vector<16x32xf32>, vector<16x32xf32> -> vector<16x32xf32>
    %cst_25 = arith.constant dense<0.000000e+00> : vector<16x96xf32>
    %49 = tpu.matmul %48, %3, %cst_25 {dimension_numbers = #tpu.dot_dimension_numbers<[1], [0], [0], [1], [0, 0, 1, 1], [], []>} : vector<16x32xf32>, vector<32x96xf32>, vector<16x96xf32> -> vector<16x96xf32>
    %50 = vector.broadcast %5 : vector<1x96xf32> to vector<16x96xf32>
    %51 = arith.addf %49, %50 : vector<16x96xf32>
    %cst_26 = arith.constant dense<0.000000e+00> : vector<16x96xf32>
    %52 = tpu.matmul %43, %4, %cst_26 {dimension_numbers = #tpu.dot_dimension_numbers<[1], [0], [0], [1], [0, 0, 1, 1], [], []>} : vector<16x32xf32>, vector<32x96xf32>, vector<16x96xf32> -> vector<16x96xf32>
    %53 = vector.broadcast %6 : vector<1x96xf32> to vector<16x96xf32>
    %54 = arith.addf %52, %53 : vector<16x96xf32>
    %55 = vector.extract_strided_slice %51 {offsets = [0, 0], sizes = [16, 32], strides = [1, 1]} : vector<16x96xf32> to vector<16x32xf32>
    %56 = vector.extract_strided_slice %54 {offsets = [0, 0], sizes = [16, 32], strides = [1, 1]} : vector<16x96xf32> to vector<16x32xf32>
    %57 = arith.addf %55, %56 : vector<16x32xf32>
    %58 = arith.negf %57 : vector<16x32xf32>
    %59 = math.exp %58 : vector<16x32xf32>
    %cst_27 = arith.constant 1.000000e+00 : f32
    %60 = vector.broadcast %cst_27 : f32 to vector<16x32xf32>
    %61 = arith.addf %60, %59 : vector<16x32xf32>
    %62 = arith.divf %60, %61 : vector<16x32xf32>
    %63 = vector.extract_strided_slice %51 {offsets = [0, 32], sizes = [16, 32], strides = [1, 1]} : vector<16x96xf32> to vector<16x32xf32>
    %64 = vector.extract_strided_slice %54 {offsets = [0, 32], sizes = [16, 32], strides = [1, 1]} : vector<16x96xf32> to vector<16x32xf32>
    %65 = arith.addf %63, %64 : vector<16x32xf32>
    %66 = arith.negf %65 : vector<16x32xf32>
    %67 = math.exp %66 : vector<16x32xf32>
    %cst_28 = arith.constant 1.000000e+00 : f32
    %68 = vector.broadcast %cst_28 : f32 to vector<16x32xf32>
    %69 = arith.addf %68, %67 : vector<16x32xf32>
    %70 = arith.divf %68, %69 : vector<16x32xf32>
    %71 = vector.extract_strided_slice %51 {offsets = [0, 64], sizes = [16, 32], strides = [1, 1]} : vector<16x96xf32> to vector<16x32xf32>
    %72 = vector.extract_strided_slice %54 {offsets = [0, 64], sizes = [16, 32], strides = [1, 1]} : vector<16x96xf32> to vector<16x32xf32>
    %73 = arith.mulf %62, %72 : vector<16x32xf32>
    %74 = arith.addf %71, %73 : vector<16x32xf32>
    %75 = math.tanh %74 : vector<16x32xf32>
    %cst_29 = arith.constant 1.000000e+00 : f32
    %76 = vector.broadcast %cst_29 : f32 to vector<16x32xf32>
    %77 = arith.subf %76, %70 : vector<16x32xf32>
    %78 = arith.mulf %77, %75 : vector<16x32xf32>
    %79 = arith.mulf %70, %43 : vector<16x32xf32>
    %80 = arith.addf %78, %79 : vector<16x32xf32>
    %c0_30 = arith.constant 0 : index
    %c0_31 = arith.constant 0 : index
    %81 = vector.load %arg8[%c0_30, %c0_31] : memref<16x32xf32, #tpu.memory_space<vmem>>, vector<16x32xf32>
    tpu.vector_store %arg8[%c0_30, %c0_31], %80 {strides = array<i32>} : memref<16x32xf32, #tpu.memory_space<vmem>>, vector<16x32xf32>,
    return
  }
  func.func @transform_0(%arg0: i32) -> (i32, i32) {
    %c0_i32 = arith.constant 0 : i32
    %c0_i32_0 = arith.constant 0 : i32
    return %arg0, %c0_i32 : i32, i32
  }
  func.func @transform_1(%arg0: i32) -> (i32, i32, i32) {
    %c0_i32 = arith.constant 0 : i32
    %c0_i32_0 = arith.constant 0 : i32
    %c0_i32_1 = arith.constant 0 : i32
    return %arg0, %c0_i32, %c0_i32_0 : i32, i32, i32
  }
  func.func @transform_2(%arg0: i32) -> (i32, i32, i32) {
    %c0_i32 = arith.constant 0 : i32
    %c0_i32_0 = arith.constant 0 : i32
    %c0_i32_1 = arith.constant 0 : i32
    %c0_i32_2 = arith.constant 0 : i32
    return %c0_i32, %c0_i32_0, %c0_i32_1 : i32, i32, i32
  }
  func.func @transform_3(%arg0: i32) -> (i32, i32) {
    %c0_i32 = arith.constant 0 : i32
    %c0_i32_0 = arith.constant 0 : i32
    %c0_i32_1 = arith.constant 0 : i32
    return %c0_i32, %c0_i32_0 : i32, i32
  }
  func.func @transform_4(%arg0: i32) -> (i32, i32) {
    %c0_i32 = arith.constant 0 : i32
    %c0_i32_0 = arith.constant 0 : i32
    %c0_i32_1 = arith.constant 0 : i32
    return %c0_i32, %c0_i32_0 : i32, i32
  }
  func.func @transform_5(%arg0: i32) -> (i32, i32) {
    %c0_i32 = arith.constant 0 : i32
    %c0_i32_0 = arith.constant 0 : i32
    %c0_i32_1 = arith.constant 0 : i32
    return %c0_i32, %c0_i32_0 : i32, i32
  }
  func.func @transform_6(%arg0: i32) -> (i32, i32) {
    %c0_i32 = arith.constant 0 : i32
    %c0_i32_0 = arith.constant 0 : i32
    %c0_i32_1 = arith.constant 0 : i32
    return %c0_i32, %c0_i32_0 : i32, i32
  }
  func.func @transform_7(%arg0: i32) -> (i32, i32) {
    %c0_i32 = arith.constant 0 : i32
    %c0_i32_0 = arith.constant 0 : i32
    return %arg0, %c0_i32 : i32, i32
  }
}

</mosaic_0001>

<bundles_post_ra>
// kernel: tpu_custom_call.1
= control target key start
LH: loop header
LB: loop body
LE: loop exit
PB: predicated region body
PF: predicated region fallthrough
CT: control target
= control target key end

     0   :  { %s2364_s0 = inlined_call_operand.hbm [shape: f32[32,32], index: 0, kind: input, shape index: {}]   ;;  %s2365_s1 = inlined_call_operand.hbm [shape: bf16[2,16,16], index: 1, kind: input, shape index: {}]   ;;  %s2366_s2 = inlined_call_operand.hbm [shape: f32[2,32,32], index: 2, kind: input, shape index: {}]   ;;  %s2367_s3 = inlined_call_operand.hbm [shape: f32[32,96], index: 3, kind: input, shape index: {}]   ;;  %s2368_s4 = inlined_call_operand.hbm [shape: f32[32,96], index: 4, kind: input, shape index: {}]   ;;  %s2369_s5 = inlined_call_operand.vmem [shape: f32[1,96], index: 5, kind: input, shape index: {}]   ;;  %s2370_s6 = inlined_call_operand.vmem [shape: f32[1,96], index: 6, kind: input, shape index: {}]   ;;  %s2371_s7 = inlined_call_operand.hbm [shape: f32[32,32], index: 7, kind: output, shape index: {}]  }
   0x1   :  { %2377 = sst [smem:[#allocation18_spill]] %s2364_s0 }
   0x2   :  { %2378 = sst [smem:[#allocation19_spill]] %s2366_s2 }
   0x3   :  { %2379 = sst [smem:[#allocation20_spill]] %s2367_s3 }
   0x4   :  { %2380 = sst [smem:[#allocation21_spill]] %s2368_s4 }
   0x5   :  { %12 = vsyncpa [#allocation3], 0 }
   0x6   :  { %14 = vsyncpa [#allocation3 + $0x1], 0 }
   0x7   :  { %15 = vsyncpa [#allocation6], 0 }
   0x8   :  { %17 = vsyncpa [#allocation6 + $0x1], 0 }
   0x9   :  { %18 = vsyncpa [#allocation9], 0 }
   0xa   :  { %19 = vsyncpa [#allocation4], 0 }
   0xb   :  { %21 = vsyncpa [#allocation4 + $0x1], 0  ;;  %s1940_s24 = smov 0   ;;  %s1942_s25 = smov 0  }
   0xc   :  { %s1944_s26 = smov 0   ;;  %s1946_s27 = smov 0  }
   0xd LB: > { %s1961_s28 = sadd.s32 4294967295, %s1883_s27   ;;  %s1313_s29 = sadd.s32 4294967294, %s1883_s27   ;;  %s1883_s27 = sphi %s1946_s27, %s2408_s27   ;;  %s1879_s26 = sphi %s1944_s26, %s2407_s26   ;;  %s1875_s25 = sphi %s1942_s25, %s2406_s25   ;;  %s1871_s24 = sphi %s1940_s24, %s2405_s24  }
   0xe   : > { %p47_p0 = scmp.ne.s32.totalorder %s1875_s25, %s1871_s24  ;;  %p2372_p1 = scmp.eq.s32.totalorder %s1961_s28, 0 }
   0xf   : > { %p208_p3 = scmp.eq.s32.totalorder %s1313_s29, 1  ;;  %p1314_p5 = scmp.ge.s32.totalorder %s1883_s27, 1 }
  0x10   : > { %p1970_p4 = por %p2372_p1, %p47_p0  ;;  %p215_p7 = scmp.lt.s32.totalorder %s1883_s27, 3 }
  0x11   : > { %p1975_p6 = por %p208_p3, %p47_p0  ;;  %s1885_s10 = smov [#allocation7]  }
  0x12   : > { %s2381_s30 = scalar_select %p1970_p4, 1, 0 }
  0x13   : > { %s2382_s8 = scalar_select %p1975_p6, 1, 0 }
  0x14   : > { %p1980_p8 = pnand %p1314_p5, %p215_p7  ;;  %s227_s11 = sshll.u32 %s1885_s10, 4  ;;  %s1984_s11 = int_to_ptr.vmem [resolvable:$true] %s227_s11 }
  0x15   : > { %2383 = sst [smem:[#allocation17_spill]] %s2382_s8  ;;  %s1886_s13 = smov [#allocation8]  }
  0x16   : > { %s2384_s9 = scalar_select %p1980_p8, 1, 0 }
  0x17   : > { %p1564_p9 = pneg %p1980_p8  ;;  %s240_s14 = sshll.u32 %s1886_s13, 4  ;;  %s1995_s14 = int_to_ptr.vmem [resolvable:$true] %s240_s14 }
  0x18   : > { %s1887_s15 = smov [#allocation10]   ;;  %s2386_s2 = sld [smem:[#allocation19_spill]] }
  0x19   : > { %p1991_p11 = pnand %p1564_p9, %p2372_p1  ;;  %s1997_s16 = sshll.u32 %s1887_s15, 4  ;;  %s254_s16 = int_to_ptr.vmem [resolvable:$true] %s1997_s16 }
  0x1b   : > { %p2007_p13 = pneg %p1991_p11 }
  0x1e   : > { %s1661_s19 = scalar_lea.hbm %s2386_s2, 1024 }
  0x1f   : > { %p1662_p12 = scmp.ne.s32.totalorder %s2386_s2, %s1661_s19  ;;  %p1668_p5 = scmp.lt.u32.totalorder %s1661_s19, %s2386_s2 }
  0x21   : > { %p1664_p0 = pnand %p2007_p13, %p1662_p12 }
  0x23   : > { %p1665_p3 = pneg %p1664_p0 }
  0x25   : > { %p1670_p7 = pnand %p1668_p5, %p1665_p3 }
  0x27   : > { %1673 = shalt.err (!%p1670_p7)
}
  0x28   : > { %s1674_s10 = scalar_lea.vmem %s1984_s11, 1024  ;;  %p1682_p2 = scmp.lt.s32.totalorder %s1984_s11, %s1984_s11 }
  0x29   : > { %p1675_p9 = scmp.ne.s32.totalorder %s1984_s11, %s1674_s10  ;;  %p1683_p6 = scmp.lt.s32.totalorder %s1674_s10, %s1674_s10 }
  0x2b   : > { %p1677_p10 = pnand %p1675_p9, %p2007_p13  ;;  %p1684_p12 = por %p1683_p6, %p1682_p2 }
  0x2d   : > { %p1678_p1 = pneg %p1677_p10 }
  0x2f   : > { %p1685_p0 = pnand %p1684_p12, %p1678_p1 }
  0x31   : > { %1688 = shalt.err (!%p1685_p0)
}
  0x32   : > { %s2376_s13 = smov 128   ;;  %s1889_s15 = smov 8  }
  0x33   : > { %1567 = dma.hbm_to_vmem [thread:$0]  (!%p1991_p11), %s2386_s2, 1024, %s1984_s11, [#allocation6], %s2376_s13, %s2376_s13, %s1889_s15  }
  0x34   : > { %s2388_s3 = sld [smem:[#allocation20_spill]] }
  0x3a   : > { %s1689_s21 = scalar_lea.hbm %s2388_s3, 512 }
  0x3b   : > { %p1690_p1 = scmp.ne.s32.totalorder %s2388_s3, %s1689_s21  ;;  %p1696_p10 = scmp.lt.u32.totalorder %s1689_s21, %s2388_s3 }
  0x3d   : > { %p1692_p2 = pnand %p1690_p1, %p2007_p13 }
  0x3f   : > { %p1693_p6 = pneg %p1692_p2 }
  0x41   : > { %p1698_p3 = pnand %p1696_p10, %p1693_p6 }
  0x43   : > { %1701 = shalt.err (!%p1698_p3)
}
  0x44   : > { %s1702_s11 = scalar_lea.vmem %s1995_s14, 512  ;;  %p1710_p12 = scmp.lt.s32.totalorder %s1995_s14, %s1995_s14 }
  0x45   : > { %p1703_p5 = scmp.ne.s32.totalorder %s1995_s14, %s1702_s11  ;;  %p1711_p0 = scmp.lt.s32.totalorder %s1702_s11, %s1702_s11 }
  0x47   : > { %p1705_p7 = pnand %p1703_p5, %p2007_p13  ;;  %p1712_p1 = por %p1711_p0, %p1710_p12 }
  0x49   : > { %p1706_p9 = pneg %p1705_p7 }
  0x4b   : > { %p1713_p2 = pnand %p1712_p1, %p1706_p9 }
  0x4d   : > { %1716 = shalt.err (!%p1713_p2)
}
  0x4e   : > { %1570 = dma.hbm_to_vmem [thread:$0]  (!%p1991_p11), %s2388_s3, 512, %s1995_s14, [#allocation9], %s2376_s13, %s2376_s13, %s1889_s15  }
  0x4f   : > { %s2389_s4 = sld [smem:[#allocation21_spill]] }
  0x55   : > { %s1717_s20 = scalar_lea.hbm %s2389_s4, 512 }
  0x56   : > { %p1718_p6 = scmp.ne.s32.totalorder %s2389_s4, %s1717_s20  ;;  %p1724_p5 = scmp.lt.u32.totalorder %s1717_s20, %s2389_s4 }
  0x58   : > { %p1720_p10 = pnand %p1718_p6, %p2007_p13 }
  0x5a   : > { %p1721_p3 = pneg %p1720_p10 }
  0x5c   : > { %p1726_p7 = pnand %p1724_p5, %p1721_p3 }
  0x5e   : > { %1729 = shalt.err (!%p1726_p7)
}
  0x5f   : > { %s1730_s11 = scalar_lea.vmem %s254_s16, 512  ;;  %p1738_p1 = scmp.lt.s32.totalorder %s254_s16, %s254_s16 }
  0x60   : > { %p1731_p9 = scmp.ne.s32.totalorder %s254_s16, %s1730_s11  ;;  %p1739_p2 = scmp.lt.s32.totalorder %s1730_s11, %s1730_s11 }
  0x62   : > { %p1733_p12 = pnand %p1731_p9, %p2007_p13  ;;  %p1740_p4 = por %p1739_p2, %p1738_p1 }
  0x64   : > { %p1734_p0 = pneg %p1733_p12 }
  0x66   : > { %p1741_p8 = pnand %p1740_p4, %p1734_p0 }
  0x68   : > { %1744 = shalt.err (!%p1741_p8)
}
  0x69   : > { %1573 = dma.hbm_to_vmem [thread:$0]  (!%p1991_p11), %s2389_s4, 512, %s254_s16, [#allocation9], %s2376_s13, %s2376_s13, %s1889_s15  }
  0x6a   : > { %s2080_s22 = sadd.s32 1, %s1883_s27   ;;  %s34_s17 = sadd.s32 1, %s1879_s26 }
  0x6b   : > { %s31_s12 = ssub.s32 %s1883_s27, %s2080_s22  ;;  %p41_p8 = scmp.ne.s32.totalorder %s1879_s26, %s1875_s25 }
  0x6c   : > { %p32_p4 = scmp.eq.s32.totalorder %s31_s12, 0  ;;  %p42_p13 = scmp.eq.s32.totalorder %s1883_s27, 0 }
  0x6d   : > { %p1588_p6 = scmp.lt.s32.totalorder %s1883_s27, 2  ;;  %p2390_p3 = scmp.eq.s32.totalorder %s1961_s28, 1 }
  0x6e   : > { %s2090_s18 = scalar_select %p32_p4, %s1879_s26, %s34_s17  }
  0x6f   : > { %p43_p10 = por %p42_p13, %p41_p8  ;;  %p2094_p5 = por %p2390_p3, %p41_p8 }
  0x70   : > { %s2099_s20 = sand.u32 1, %s1879_s26   ;;  %s1359_s16 = sshll.u32 %s1883_s27, 8 }
  0x71   : > { %s1319_s21 = sshll.u32 %s2099_s20, 4  ;;  %s2392_s0 = sld [smem:[#allocation18_spill]] }
  0x72   : > { %s277_s11 = scalar_lea.vmem [#allocation2], %s1319_s21  ;;  %p2108_p11 = pnand %p1588_p6, %p43_p10 }
  0x73   : > { %s284_s14 = sshll.u32 %s277_s11, 4  ;;  %s274_s17 = scalar_lea.sflag [#allocation3], %s2099_s20  ;;  %s2112_s14 = int_to_ptr.vmem [resolvable:$true] %s284_s14 }
  0x74   : > { %p1747_p9 = pneg %p2108_p11 }
  0x77   : > { %s2106_s10 = scalar_lea.hbm %s2392_s0, %s1359_s16  ;;  %s1750_s23 = scalar_lea.hbm %s2392_s0, 512 }
  0x78   : > { %s1745_s13 = scalar_lea.hbm %s2106_s10, 256  ;;  %p1751_p1 = scmp.lt.u32.totalorder %s2106_s10, %s2392_s0 }
  0x79   : > { %p1746_p7 = scmp.ne.s32.totalorder %s2106_s10, %s1745_s13  ;;  %p1752_p2 = scmp.lt.u32.totalorder %s1750_s23, %s1745_s13 }
  0x7a   : > { %p1754_p8 = scmp.lt.u32.totalorder %s1745_s13, %s2106_s10 }
  0x7b   : > { %p1748_p12 = pnand %p1747_p9, %p1746_p7  ;;  %p1753_p4 = por %p1752_p2, %p1751_p1 }
  0x7d   : > { %p1749_p0 = pneg %p1748_p12  ;;  %p1755_p13 = por %p1754_p8, %p1753_p4 }
  0x7f   : > { %p1756_p6 = pnand %p1755_p13, %p1749_p0 }
  0x81   : > { %1759 = shalt.err (!%p1756_p6)
}
  0x82   : > { %s1760_s12 = scalar_lea.vmem %s2112_s14, 256  ;;  %s1890_s16 = smov [#allocation2]  }
  0x83   : > { %p1761_p10 = scmp.ne.s32.totalorder %s2112_s14, %s1760_s12  ;;  %s1765_s21 = sshll.u32 %s1890_s16, 4  ;;  %s1766_s21 = int_to_ptr.vmem [resolvable:$false] %s1765_s21 }
  0x84   : > { %s1767_s29 = scalar_lea.vmem %s1766_s21, 512  ;;  %p1768_p12 = scmp.lt.s32.totalorder %s2112_s14, %s1766_s21 }
  0x85   : > { %p1763_p3 = pnand %p1761_p10, %p1747_p9  ;;  %p1769_p1 = scmp.lt.s32.totalorder %s1767_s29, %s1760_s12 }
  0x87   : > { %p1764_p7 = pneg %p1763_p3  ;;  %p1770_p2 = por %p1769_p1, %p1768_p12 }
  0x89   : > { %p1771_p4 = pnand %p1770_p2, %p1764_p7 }
  0x8b   : > { %1774 = shalt.err (!%p1771_p4)
}
  0x8c   : > { %s2394_s13 = smov 128   ;;  %s1322_s23 = sshll.u32 %s2099_s20, 3 }
  0x8d   : > { %1577 = dma.hbm_to_vmem [thread:$0]  (!%p2108_p11), %s2106_s10, 256, %s2112_s14, %s274_s17, %s2394_s13, %s2394_s13, %s1889_s15  }
  0x8e   : > { %s1360_s11 = sshll.u32 %s1883_s27, 7  ;;  %s298_s29 = scalar_lea.vmem [#allocation5], %s1322_s23 }
  0x8f   : > { %s2151_s21 = scalar_lea.hbm %s2365_s1, %s1360_s11  ;;  %s305_s0 = sshll.u32 %s298_s29, 4  ;;  %s2153_s0 = int_to_ptr.vmem [resolvable:$true] %s305_s0 }
  0x90   : > { %s2395_s2 = sand.u32 1, %s1883_s27   ;;  %s1775_s4 = scalar_lea.hbm %s2151_s21, 128 }
  0x91   : > { %s2157_s3 = scalar_lea.sflag [#allocation6], %s2395_s2  ;;  %p1776_p0 = scmp.ne.s32.totalorder %s2151_s21, %s1775_s4 }
  0x92   : > { %s1780_s10 = scalar_lea.hbm %s2365_s1, 256  ;;  %p1781_p6 = scmp.lt.u32.totalorder %s2151_s21, %s2365_s1 }
  0x93   : > { %p1778_p8 = pnand %p1776_p0, %p1747_p9  ;;  %p1782_p10 = scmp.lt.u32.totalorder %s1780_s10, %s1775_s4 }
  0x94   : > { %p1784_p7 = scmp.lt.u32.totalorder %s1775_s4, %s2151_s21 }
  0x95   : > { %p1779_p13 = pneg %p1778_p8  ;;  %p1783_p3 = por %p1782_p10, %p1781_p6 }
  0x97   : > { %p1785_p12 = por %p1784_p7, %p1783_p3 }
  0x99   : > { %p1786_p1 = pnand %p1785_p12, %p1779_p13 }
  0x9b   : > { %1789 = shalt.err (!%p1786_p1)
}
  0x9c   : > { %s1790_s2 = scalar_lea.vmem %s2153_s0, 128  ;;  %s1891_s13 = smov [#allocation5]  }
  0x9d   : > { %p1791_p2 = scmp.ne.s32.totalorder %s2153_s0, %s1790_s2  ;;  %s1795_s23 = sshll.u32 %s1891_s13, 4  ;;  %s1796_s23 = int_to_ptr.vmem [resolvable:$false] %s1795_s23 }
  0x9e   : > { %s1797_s11 = scalar_lea.vmem %s1796_s23, 256  ;;  %p1798_p8 = scmp.lt.s32.totalorder %s2153_s0, %s1796_s23 }
  0x9f   : > { %p1793_p4 = pnand %p1791_p2, %p1747_p9  ;;  %p1799_p6 = scmp.lt.s32.totalorder %s1797_s11, %s1790_s2 }
  0xa1   : > { %p1794_p0 = pneg %p1793_p4  ;;  %p1800_p10 = por %p1799_p6, %p1798_p8 }
  0xa3   : > { %p1801_p3 = pnand %p1800_p10, %p1794_p0 }
  0xa5   : > { %1804 = shalt.err (!%p1801_p3)
}
  0xa6   : > { %s1892_s4 = smov 64   ;;  %s1893_s12 = smov 4  }
  0xa7   : > { %1580 = dma.hbm_to_vmem [thread:$0]  (!%p2108_p11), %s2151_s21, 128, %s2153_s0, %s2157_s3, %s1892_s4, %s1892_s4, %s1893_s12  }
  0xa8   : > { %p2396_p9 = scmp.ne.s32.totalorder %s2384_s9, 0 }
  0xa9   : > { %s2186_s16 = sand.u32 (!%p2396_p9), 1, %s1875_s25   ;;  %p2397_p13 = scmp.ne.s32.totalorder (!%p2396_p9), %s2381_s30, 0 }
  0xaa   : > { %317 = sbr.rel (%p2396_p9) target bundleno = 2298 (0x8fa), region = 48  ;;  %s1326_s29 = sshll.u32 (!%p2396_p9), %s2186_s16, 4 }
  0xab   : > { %s320_s15 = scalar_lea.sflag (!%p2396_p9), [#allocation3], %s2186_s16  ;;  %s323_s20 = scalar_lea.vmem (!%p2396_p9), [#allocation2], %s1326_s29 }
  0xb1   : > { %1850 = dma.done.wait (%p2397_p13), %s320_s15, 256  }
  0xb2   : > { %1852 = vsyncadd (%p2397_p13), %s320_s15, 4294967040  ;;  %s328_s0 = sand.u32 1, %s1961_s28   ;;  %s1327_s3 = sshll.u32 %s2186_s16, 3 }
  0xb3   : > { %s329_s9 = scalar_lea.sflag [#allocation6], %s328_s0  ;;  %s332_s8 = scalar_lea.vmem [#allocation5], %s1327_s3 }
  0xb4   : > { %1854 = dma.done.wait (%p2397_p13), %s329_s9, 128  }
  0xb5   : > { %1856 = vsyncadd (%p2397_p13), %s329_s9, 4294967168  ;;  %p2398_p11 = scmp.eq.s32.totalorder %s1961_s28, 0 }
  0xb7   : > { %1858 = dma.done.wait (%p2398_p11), [#allocation6], 1024   ;;  %p2399_p7 = pmov %p2398_p11 }
  0xb9   : > { %1860 = vsyncadd (%p2399_p7), [#allocation6], 4294966272  ;;  %p2400_p12 = pmov %p2399_p7 }
  0xba   : > { %p2401_p1 = pmov %p2399_p7 }
  0xbb   : > { %1862 = dma.done.wait (%p2400_p12), [#allocation9], 1024  }
  0xbc   : > { %1864 = vsyncadd (%p2401_p1), [#allocation9], 4294966272  ;;  %vm402_vm0 = vcmask 261120   ;;  %v398_v0 = vld [vmem:[#allocation7] sm:$0xff]  ;;  %v399_v1 = vld [vmem:[#allocation7 + $0x8] sm:$0xff]  ;;  %vm484_vm1 = vcmask 130048  }
  0xbd   : > { %v400_v2 = vld [vmem:[#allocation7 + $0x10] sm:$0xff]  ;;  %v1490_v3 = vpack.c.bf16 %v399_v1, %v398_v0  ;;  %v401_v4 = vld [vmem:[#allocation7 + $0x18] sm:$0xff]  ;;  %v392_v10 = vld [vmem:[#allocation10] sm:$0xff]  ;;  %s1894_s10 = smov 64   ;;  %s1895_s2 = smov 32  }
  0xbe   : > { %v2210_v5 = vld [vmem:[%s323_s20] sm:$0xff]  ;;  %v1494_v6 = vpack.c.bf16 %v401_v4, %v400_v2  ;;  %v2214_v7 = vld [vmem:[%s323_s20 + $0x8] sm:$0xff]  ;;  %s1896_s13 = smov 96   ;;  %s379_s23 = scalar_lea.vmem [#allocation11], %s1326_s29 }
  0xbf   : > { %1418 = vmatprep.mubr.msk.f32.mxu0 %vm402_vm0, %v2210_v5  ;;  %1491 = vmatprep.subr.bf16.mxu0 %v1490_v3  ;;  %v2220_v8 = vld [vmem:[%s332_s8] sm:$0xff]   ;;  %v393_v11 = vld [vmem:[#allocation10 + $0x8] sm:$0xff]  ;;  %v388_v16 = vld [vmem:[#allocation8] sm:$0xff]  ;;  %s1189_s11 = sshll.u32 %s379_s23, 4  ;;  %s1361_s4 = sshll.u32 %s1961_s28, 8  ;;  %s2313_s11 = int_to_ptr.vmem [resolvable:$true] %s1189_s11 }
  0xc0   : > { %1493 = vmatpush3.bf16.msra.mxu0 %v1490_v3  ;;  %v1364_v9 = vunpack.c.l.bf16 %v2220_v8  ;;  %v394_v12 = vld [vmem:[#allocation10 + $0x10] sm:$0xff]  ;;  %v2224_v13 = vpack.c.bf16 %v393_v11, %v392_v10  ;;  %v395_v14 = vld [vmem:[#allocation10 + $0x18] sm:$0xff]  ;;  %v389_v17 = vld [vmem:[#allocation8 + $0x8] sm:$0xff]  ;;  %v1365_v24 = vunpack.c.h.bf16 %v2220_v8  ;;  %s2318_s20 = scalar_lea.hbm %s2371_s7, %s1361_s4  ;;  %s1176_s0 = scalar_lea.sflag [#allocation4], %s2186_s16 }
  0xc1   : > { %1495 = vmatprep.subr.bf16.mxu0 %v1494_v6  ;;  %v2226_v15 = vpack.c.bf16 %v395_v14, %v394_v12  ;;  %v2235_v21 = vpack.c.bf16 %v389_v17, %v388_v16  ;;  %v390_v22 = vld [vmem:[#allocation8 + $0x10] sm:$0xff]  ;;  %v391_v23 = vld [vmem:[#allocation8 + $0x18] sm:$0xff]  ;;  %v793_v56 = vld [vmem:[#allocation7 + $0x20] sm:$0xff]  ;;  %s1805_s29 = scalar_lea.vmem %s2313_s11, 256  ;;  %s1897_s28 = smov [#allocation11]  }
  0xc2   : > { %1425 = vmatprep.mubr.msk.f32.mxu1 %vm484_vm1, %v1364_v9  ;;  %v2239_v25 = vpack.c.bf16 %v391_v23, %v390_v22  ;;  %v2250_v26 = vld [vmem:[%s2370_s6] ss:$0 sm:$0xff]  ;;  %v794_v57 = vld [vmem:[#allocation7 + $0x28] sm:$0xff]  ;;  %v796_v60 = vld [vmem:[#allocation7 + $0x38] sm:$0xff]  ;;  %p1806_p2 = scmp.ne.s32.totalorder %s2313_s11, %s1805_s29  ;;  %s1809_s3 = sshll.u32 %s1897_s28, 4  ;;  %s1810_s3 = int_to_ptr.vmem [resolvable:$false] %s1809_s3 }
  0xc3   : > { %v2261_v33 = vld [vmem:[%s2369_s5] ss:$0 sm:$0xff]  ;;  %v1518_v59 = vpack.c.bf16 %v794_v57, %v793_v56  ;;  %s1811_s9 = scalar_lea.vmem %s1810_s3, 512  ;;  %p1812_p8 = scmp.lt.s32.totalorder %s2313_s11, %s1810_s3 }
  0xc4   : > { %1497 = vmatpush3.bf16.msra.mxu0 %v1494_v6  ;;  %v795_v58 = vld [vmem:[#allocation7 + $0x30] sm:$0xff]  ;;  %p1807_p4 = pnand %p1806_p2, %p2094_p5  ;;  %p1813_p6 = scmp.lt.s32.totalorder %s1811_s9, %s1805_s29 }
  0xc5   : > { %1511 = vmatprep.subr.bf16.mxu0 %v2224_v13  ;;  %v1522_v61 = vpack.c.bf16 %v796_v60, %v795_v58 }
  0xc6   : > { %p1808_p0 = pneg %p1807_p4  ;;  %p1814_p10 = por %p1813_p6, %p1812_p8 }
  0xc7   : > { %1419 = vmatmul.mubr.msk.f32.vlgmr.msra.gmra.mrb[0].mxu0 %vm402_vm0, %v2214_v7 }
  0xc8   : > { %1447 = vmatprep.mubr.msk.f32.mxu0 %vm402_vm0, %v2210_v5  ;;  %1513 = vmatpush3.bf16.msra.mxu0 %v2224_v13  ;;  %p1815_p3 = pnand %p1814_p10, %p1808_p0 }
  0xc9   : > { %1515 = vmatprep.subr.bf16.mxu0 %v2226_v15 }
  0xcc   : > { %1517 = vmatpush3.bf16.msra.mxu0 %v2226_v15 }
  0xcf   : > { %1448 = vmatmul.mubr.msk.f32.vlgmr.msra.gmra.mrb[2].mxu0 %vm402_vm0, %v2214_v7 }
  0xd0   : > { %1465 = vmatprep.mubr.msk.f32.mxu0 %vm484_vm1, %v1364_v9 }
 0x19a   : > { %v1420_v18 = vpop.f32.mrb[0].mxu0 }
 0x19b   : > { %v475_v19 = vpop.f32.mrb[1].mxu0 }
 0x19c   : > { %v1498_v20 = vpack.c.bf16 %v1420_v18, %v475_v19 }
 0x19e   : > { %1499 = vmatprep.subr.bf16.mxu1 %v1498_v20 }
 0x19f   : > { %1501 = vmatpush3.bf16.msra.mxu1 %v1498_v20 }
 0x1a0   : > { %1503 = vmatprep.subr.bf16.mxu1 %v2235_v21 }
 0x1a2   : > { %1426 = vmatmul.mubr.msk.f32.vlgmr.msra.gmra.mrb[0].mxu1 %vm484_vm1, %v1365_v24  ;;  %v1449_v27 = vpop.f32.mrb[2].mxu0 }
 0x1a3   : > { %1505 = vmatpush3.bf16.msra.mxu1 %v2235_v21  ;;  %v725_v28 = vpop.f32.mrb[3].mxu0  ;;  %v731_v30 = vadd.f32 %v1449_v27, %v2250_v26 }
 0x1a4   : > { %1507 = vmatprep.subr.bf16.mxu1 %v2239_v25  ;;  %v726_v29 = vadd.f32 %v2250_v26, %v725_v28 }
 0x1a6   : > { %750 = vrot.lane.b32.xlu0 %v726_v29, %s1894_s10 }
 0x1a7   : > { %1509 = vmatpush3.bf16.msra.mxu1 %v2239_v25 }
 0x1a8   : > { %1519 = vmatprep.subr.bf16.mxu1 %v1518_v59 }
 0x1aa   : > { %752 = vrot.lane.b32.xlu0 %v731_v30, %s1894_s10 }
 0x218   : > { %v751_v46 = vpop.permute.xlu0 %750 }
 0x21c   : > { %v753_v50 = vpop.permute.xlu0 %752 }
 0x275   : > { %v1427_v31 = vpop.f32.mrb[0].mxu1 }
 0x276   : > { %v557_v32 = vpop.f32.mrb[1].mxu1 }
 0x277   : > { %1436 = vmatprep.mubr.msk.f32.mxu1 %vm402_vm0, %v557_v32 }
 0x278   : > { %1437 = vmatmul.mubr.msk.f32.vlgmr.msra.gmra.mrb[2].mxu1 %vm402_vm0, %v1427_v31 }
 0x279   : > { %1521 = vmatpush3.bf16.msra.mxu1 %v1518_v59 }
 0x27a   : > { %1523 = vmatprep.subr.bf16.mxu1 %v1522_v61 }
 0x27d   : > { %1525 = vmatpush3.bf16.msra.mxu1 %v1522_v61 }
 0x27e   : > { %1539 = vmatprep.subr.bf16.mxu1 %v2224_v13 }
 0x34b   : > { %v1438_v34 = vpop.f32.mrb[2].mxu1 }
 0x34c   : > { %v650_v35 = vadd.f32 %v1438_v34, %v2261_v33  ;;  %v644_v36 = vpop.f32.mrb[3].mxu1 }
 0x34d   : > { %v645_v37 = vadd.f32 %v2261_v33, %v644_v36 }
 0x34e   : > { %v735_v38 = vadd.f32 %v731_v30, %v650_v35 }
 0x34f   : > { %v734_v39 = vadd.f32 %v726_v29, %v645_v37 }
 0x350   : > { %v1343_v40 = vmul.f32 -1.442695, %v735_v38 }
 0x351   : > { %v1342_v41 = vmul.f32 -1.442695, %v734_v39 }
 0x352   : > { %1637 = vpow2.f32 %v1343_v40 }
 0x353   : > { %1639 = vpow2.f32 %v1342_v41 }
 0x35c   : > { %v1638_v42 = vpop.eup %1637 }
 0x35d   : > { %v1640_v43 = vpop.eup %1639  ;;  %v743_v44 = vadd.f32 1.0, %v1638_v42 }
 0x35e   : > { %v742_v45 = vadd.f32 1.0, %v1640_v43 }
 0x360   : > { %1641 = vrcp.f32 %v742_v45 }
 0x361   : > { %1643 = vrcp.f32 %v743_v44 }
 0x36a   : > { %v1642_v47 = vpop.eup %1641 }
 0x36b   : > { %v756_v48 = vmul.f32 %v1642_v47, %v751_v46  ;;  %v1644_v49 = vpop.eup %1643  ;;  %v770_v1 = vsub.f32 1.0, %v1642_v47 }
 0x36c   : > { %v757_v51 = vmul.f32 %v1644_v49, %v753_v50 }
 0x36d   : > { %760 = vrot.lane.b32.xlu1 %v756_v48, %s1894_s10 }
 0x371   : > { %762 = vrot.lane.b32.xlu1 %v757_v51, %s1894_s10 }
 0x375   : > { %782 = vrot.lane.b32.xlu1 %v2210_v5, %s1895_s2 }
 0x379   : > { %784 = vrot.lane.b32.xlu1 %v2214_v7, %s1895_s2  ;;  %v771_v7 = vsub.f32 1.0, %v1644_v49 }
 0x3df   : > { %v761_v52 = vpop.permute.xlu1 %760 }
 0x3e0   : > { %v766_v53 = vadd.f32 %v761_v52, %v645_v37 }
 0x3e2   : > { %1645 = vtanh.f32 %v766_v53 }
 0x3e3   : > { %v763_v54 = vpop.permute.xlu1 %762 }
 0x3e4   : > { %v767_v55 = vadd.f32 %v763_v54, %v650_v35 }
 0x3e6   : > { %1647 = vtanh.f32 %v767_v55 }
 0x3e7   : > { %v783_v0 = vpop.permute.xlu1 %782 }
 0x3e8   : > { %v788_v3 = vmul.f32 %v1642_v47, %v783_v0 }
 0x3eb   : > { %v785_v5 = vpop.permute.xlu1 %784 }
 0x3ec   : > { %v1646_v62 = vpop.eup %1645  ;;  %v789_v10 = vmul.f32 %v1644_v49, %v785_v5 }
 0x3ed   : > { %774 = vrot.lane.b32.xlu0 %v1646_v62, %s1896_s13 }
 0x3f0   : > { %v1648_v63 = vpop.eup %1647 }
 0x3f1   : > { %776 = vrot.lane.b32.xlu0 %v1648_v63, %s1896_s13 }
 0x45f   : > { %v775_v2 = vpop.permute.xlu0 %774 }
 0x460   : > { %v780_v4 = vmul.f32 %v775_v2, %v770_v1 }
 0x462   : > { %v2272_v6 = vadd.f32 %v788_v3, %v780_v4 }
 0x463   : > { %v777_v9 = vpop.permute.xlu0 %776 }
 0x464   : > { %v781_v11 = vmul.f32 %v777_v9, %v771_v7  ;;  %799 = vrot.lane.b32.xlu0 %v2272_v6, %s1896_s13 }
 0x466   : > { %v2276_v12 = vadd.f32 %v789_v10, %v781_v11 }
 0x468   : > { %801 = vrot.lane.b32.xlu1 %v2276_v12, %s1896_s13 }
 0x4d6   : > { %v800_v14 = vpop.permute.xlu0 %799 }
 0x4d7   : > { %1458 = vmatprep.mubr.msk.f32.mxu1 %vm402_vm0, %v800_v14 }
 0x4da   : > { %v802_v16 = vpop.permute.xlu1 %801 }
 0x4db   : > { %1459 = vmatmul.mubr.msk.f32.vlgmr.msra.gmra.mrb[4].mxu1 %vm402_vm0, %v802_v16 }
 0x4dc   : > { %1541 = vmatpush3.bf16.msra.mxu1 %v2224_v13  ;;  %1487 = vmatprep.mubr.msk.f32.mxu1 %vm402_vm0, %v800_v14 }
 0x4dd   : > { %1543 = vmatprep.subr.bf16.mxu1 %v2226_v15 }
 0x4e0   : > { %1545 = vmatpush3.bf16.msra.mxu1 %v2226_v15 }
 0x4e3   : > { %1488 = vmatmul.mubr.msk.f32.vlgmr.msra.gmra.mrb[6].mxu1 %vm402_vm0, %v802_v16 }
 0x5ae   : > { %v1460_v17 = vpop.f32.mrb[4].mxu1 }
 0x5af   : > { %v873_v18 = vpop.f32.mrb[5].mxu1 }
 0x5b0   : > { %v1526_v19 = vpack.c.bf16 %v1460_v17, %v873_v18 }
 0x5b2   : > { %1527 = vmatprep.subr.bf16.mxu0 %v1526_v19 }
 0x5b3   : > { %1529 = vmatpush3.bf16.msra.mxu0 %v1526_v19 }
 0x5b4   : > { %1531 = vmatprep.subr.bf16.mxu0 %v2235_v21 }
 0x5b6   : > { %v1489_v20 = vpop.f32.mrb[6].mxu1  ;;  %1466 = vmatmul.mubr.msk.f32.vlgmr.msra.gmra.mrb[4].mxu0 %vm484_vm1, %v1365_v24 }
 0x5b7   : > { %v1110_v13 = vadd.f32 %v1489_v20, %v2250_v26  ;;  %v1104_v22 = vpop.f32.mrb[7].mxu1  ;;  %1533 = vmatpush3.bf16.msra.mxu0 %v2235_v21 }
 0x5b8   : > { %v1105_v15 = vadd.f32 %v2250_v26, %v1104_v22  ;;  %1535 = vmatprep.subr.bf16.mxu0 %v2239_v25 }
 0x5b9   : > { %1131 = vrot.lane.b32.xlu1 %v1110_v13, %s1894_s10 }
 0x5ba   : > { %1129 = vrot.lane.b32.xlu0 %v1105_v15, %s1894_s10 }
 0x5bb   : > { %1537 = vmatpush3.bf16.msra.mxu0 %v2239_v25 }
 0x62b   : > { %v1132_v37 = vpop.permute.xlu1 %1131 }
 0x62c   : > { %v1130_v39 = vpop.permute.xlu0 %1129 }
 0x689   : > { %v1467_v23 = vpop.f32.mrb[4].mxu0 }
 0x68a   : > { %v948_v27 = vpop.f32.mrb[5].mxu0 }
 0x68b   : > { %1476 = vmatprep.mubr.msk.f32.mxu0 %vm402_vm0, %v948_v27 }
 0x68c   : > { %1477 = vmatmul.mubr.msk.f32.vlgmr.msra.gmra.mrb[6].mxu0 %vm402_vm0, %v1467_v23 }
 0x75f   : > { %v1478_v8 = vpop.f32.mrb[6].mxu0 }
 0x760   : > { %v1035_v24 = vadd.f32 %v1478_v8, %v2261_v33  ;;  %v1029_v21 = vpop.f32.mrb[7].mxu0 }
 0x761   : > { %v1030_v26 = vadd.f32 %v2261_v33, %v1029_v21 }
 0x762   : > { %v1114_v28 = vadd.f32 %v1110_v13, %v1035_v24 }
 0x763   : > { %v1113_v29 = vadd.f32 %v1105_v15, %v1030_v26 }
 0x764   : > { %v1353_v30 = vmul.f32 -1.442695, %v1114_v28 }
 0x765   : > { %v1352_v31 = vmul.f32 -1.442695, %v1113_v29 }
 0x766   : > { %1649 = vpow2.f32 %v1353_v30 }
 0x767   : > { %1651 = vpow2.f32 %v1352_v31 }
 0x770   : > { %v1650_v32 = vpop.eup %1649 }
 0x771   : > { %v1652_v25 = vpop.eup %1651  ;;  %v1122_v34 = vadd.f32 1.0, %v1650_v32 }
 0x772   : > { %v1121_v35 = vadd.f32 1.0, %v1652_v25 }
 0x773   : > { %1653 = vrcp.f32 %v1122_v34 }
 0x774   : > { %1655 = vrcp.f32 %v1121_v35 }
 0x77d   : > { %v1654_v36 = vpop.eup %1653 }
 0x77e   : > { %v1656_v38 = vpop.eup %1655  ;;  %v1136_v40 = vmul.f32 %v1654_v36, %v1132_v37  ;;  %v1150_v47 = vsub.f32 1.0, %v1654_v36  ;;  %v1162_v50 = vmul.f32 %v1654_v36, %v2276_v12 }
 0x77f   : > { %v1135_v41 = vmul.f32 %v1656_v38, %v1130_v39  ;;  %v1149_v49 = vsub.f32 1.0, %v1656_v38  ;;  %v1161_v53 = vmul.f32 %v1656_v38, %v2272_v6 }
 0x780   : > { %1141 = vrot.lane.b32.xlu1 %v1136_v40, %s1894_s10 }
 0x781   : > { %1139 = vrot.lane.b32.xlu0 %v1135_v41, %s1894_s10 }
 0x7f2   : > { %v1142_v33 = vpop.permute.xlu1 %1141 }
 0x7f3   : > { %v1146_v42 = vadd.f32 %v1142_v33, %v1035_v24  ;;  %v1140_v43 = vpop.permute.xlu0 %1139 }
 0x7f4   : > { %v1145_v44 = vadd.f32 %v1140_v43, %v1030_v26 }
 0x7f5   : > { %1657 = vtanh.f32 %v1146_v42 }
 0x7f6   : > { %1659 = vtanh.f32 %v1145_v44 }
 0x7ff   : > { %v1658_v45 = vpop.eup %1657 }
 0x800   : > { %v1660_v46 = vpop.eup %1659  ;;  %1155 = vrot.lane.b32.xlu1 %v1658_v45, %s1896_s13 }
 0x801   : > { %1153 = vrot.lane.b32.xlu0 %v1660_v46, %s1896_s13 }
 0x872   : > { %v1156_v48 = vpop.permute.xlu1 %1155 }
 0x873   : > { %v1160_v51 = vmul.f32 %v1156_v48, %v1150_v47  ;;  %v1154_v52 = vpop.permute.xlu0 %1153 }
 0x874   : > { %v1159_v54 = vmul.f32 %v1154_v52, %v1149_v49 }
 0x875   : > { %v1164_v55 = vadd.f32 %v1162_v50, %v1160_v51 }
 0x876   : > { %v1163_v56 = vadd.f32 %v1161_v53, %v1159_v54 }
 0x877   : > { %1169 = vrot.lane.b32.xlu1 %v1164_v55, %s1896_s13 }
 0x878   : > { %1167 = vrot.lane.b32.xlu0 %v1163_v56, %s1896_s13 }
 0x8e9   : > { %v1170_v57 = vpop.permute.xlu1 %1169 }
 0x8ea   : > { %1174 = vst.msk [vmem:[%s379_s23 + $0x8] sm:$0xff] %vm402_vm0, %v1170_v57  ;;  %v1168_v58 = vpop.permute.xlu0 %1167 }
 0x8eb   : > { %1173 = vst.msk [vmem:[%s379_s23] sm:$0xff] %vm402_vm0, %v1168_v58 }
 0x8ec   : > { %1818 = shalt.err (!%p1815_p3)
}
 0x8ed   : > { %s1819_s8 = scalar_lea.hbm %s2318_s20, 256  ;;  %s1823_s10 = scalar_lea.hbm %s2371_s7, 512 }
 0x8ee   : > { %p1820_p9 = scmp.ne.s32.totalorder %s2318_s20, %s1819_s8  ;;  %p1824_p7 = scmp.lt.u32.totalorder %s2318_s20, %s2371_s7 }
 0x8ef   : > { %p1825_p12 = scmp.lt.u32.totalorder %s1823_s10, %s1819_s8  ;;  %p1827_p2 = scmp.lt.u32.totalorder %s1819_s8, %s2318_s20 }
 0x8f0   : > { %p1821_p13 = pnand %p1820_p9, %p2094_p5 }
 0x8f1   : > { %p1826_p1 = por %p1825_p12, %p1824_p7 }
 0x8f2   : > { %p1822_p11 = pneg %p1821_p13 }
 0x8f3   : > { %p1828_p4 = por %p1827_p2, %p1826_p1 }
 0x8f5   : > { %p1829_p0 = pnand %p1828_p4, %p1822_p11 }
 0x8f7   : > { %1832 = shalt.err (!%p1829_p0)
}
 0x8f8   : > { %s1898_s2 = smov 128   ;;  %s1899_s13 = smov 8  }
 0x8f9   : > { %1562 = dma.vmem_to_hbm [thread:$0]  (%p2094_p5), %s2313_s11, 256, %s2318_s20, %s1176_s0, %s1898_s2, %s1898_s2, %s1899_s13  }
 0x8fa PF: > { %s2402_s23 = sld [smem:[#allocation17_spill]]  ;;  %s1204_s4 = sand.u32 1, %s1871_s24  }
 0x8fb   : > { %p2404_p6 = scmp.ge.s32.totalorder %s1883_s27, 2  ;;  %s1205_s12 = scalar_lea.sflag [#allocation4], %s1204_s4 }
 0x900   : > { %p2403_p8 = scmp.ne.s32.totalorder %s2402_s23, 0 }
 0x902   : > { %p1582_p10 = pnand %p2404_p6, %p2403_p8 }
 0x904   : > { %1866 = dma.done.wait (!%p1582_p10), %s1205_s12, 256  }
 0x905   : > { %1868 = vsyncadd (!%p1582_p10), %s1205_s12, 4294967040  ;;  %p24_p3 = scmp.ge.s32.totalorder %s2080_s22, 4   ;;  %s2405_s24 = smov %s1875_s25 }
 0x906   : > { %s2406_s25 = smov %s1879_s26  ;;  %s2407_s26 = smov %s2090_s18 }
 0x907   : > { %s2408_s27 = smov %s2080_s22  ;;  %26 = sbr.rel (!%p24_p3) target bundleno = 13 (0xd), region = 119 }
 0x90e   :  { %1210 = vsyncpa [#allocation3], 1 }
 0x90f   :  { %1212 = vsyncpa [#allocation3 + $0x1], 1 }
 0x910   :  { %1213 = vsyncpa [#allocation6], 1 }
 0x911   :  { %1215 = vsyncpa [#allocation6 + $0x1], 1 }
 0x912   :  { %1216 = vsyncpa [#allocation9], 1 }
 0x913   :  { %1217 = vsyncpa [#allocation4], 1 }
 0x914   :  { %1219 = vsyncpa [#allocation4 + $0x1], 1 }

</bundles_post_ra>
